<compile_context>
chip_gen: v6e
topology: v6e:2x2x1
jax: 0.10.0
libtpu: 0.0.40
codegen_flags: <defaults>
</compile_context>

<pallas_src>
import math

import numpy as np
import jax
import jax.numpy as jnp
from jax.experimental import pallas as pl
from jax.experimental.pallas import tpu as pltpu


# ----------------------------------------------------------------------------
# Deterministic camera parameter construction (replicates the PyTorch __init__;
# the mitsuba look_at transform is re-implemented in numpy).
# ----------------------------------------------------------------------------
def get_camera_intrinsic(vfov=25, img_width=800, img_height=800):
    hfov = vfov * img_width / img_height
    fy = img_height * 0.5 / math.tan(vfov * 0.5 * math.pi / 180)
    fx = img_width * 0.5 / math.tan(hfov * 0.5 * math.pi / 180)
    Ox = img_width / 2.0
    Oy = img_height / 2.0
    return np.array([[fx, 0.0, Ox], [0.0, fy, Oy], [0.0, 0.0, 1.0]],
                    dtype=np.float32)


def _look_at_matrix(origin, target, up):
    # Mitsuba Transform4f.look_at convention: columns [left, new_up, dir, origin]
    origin = np.asarray(origin, dtype=np.float64)
    target = np.asarray(target, dtype=np.float64)
    up = np.asarray(up, dtype=np.float64)
    d = target - origin
    d = d / np.linalg.norm(d)
    left = np.cross(up, d)
    left = left / np.linalg.norm(left)
    new_up = np.cross(d, left)
    m = np.eye(4, dtype=np.float64)
    m[:3, 0] = left
    m[:3, 1] = new_up
    m[:3, 2] = d
    m[:3, 3] = origin
    return m


def get_camera_extrinsics(origin=(3, 3, 3), target=(0, 0, 0), up=(0, 1, 0)):
    views = np.linalg.inv(_look_at_matrix(origin, target, up))
    views[2, :] = -views[2, :]
    return views[:3, :].astype(np.float32)          # (3, 4)


def init_camera_config(batch_size=32, fov=25, img_width=800, img_height=800):
    K = get_camera_intrinsic(fov, img_width, img_height)          # (3, 3)
    origin_list = [[3, 3, 3], [3, 3, -3], [-3, 3, -3], [-3, 3, 3]]
    ext = np.stack([get_camera_extrinsics(origin=o) for o in origin_list])  # (4,3,4)
    ext = np.broadcast_to(ext[None], (batch_size, 4, 3, 4)).copy()
    return K, ext.astype(np.float32)


# ----------------------------------------------------------------------------
# Pallas kernel: one grid step = one (batch, N-tile) pair, ALL views at once.
# Refs seen by the kernel:
#   p_ref   : (V, 12) f32        folded projection matrices P = K @ ext (per batch)
#   pc_ref  : (3, NT) f32        point-cloud tile for this batch
#   seg_ref : (V, H, W) bf16/int8 host-binarized (0/1) segmentation images
#   out_ref : (V, NT) int8       0/1 masks
#   res_ref : (V, NT) f32        VMEM scratch (per-view rows, avoids concat)
# ----------------------------------------------------------------------------
def projector_kernel(p_ref, pc_ref, seg_ref, out_ref, res_ref):
    V, H, W = seg_ref.shape
    NT = pc_ref.shape[1]
    int_path = jnp.issubdtype(seg_ref.dtype, jnp.integer)
    acc_dtype = jnp.int32 if int_path else jnp.float32

    x = pc_ref[0:1, :]                              # (1, NT)
    y = pc_ref[1:2, :]
    z = pc_ref[2:3, :]

    # --- projection, batched over all V views (VPU only; MXU stays free) ---
    p = p_ref[...]                                  # (V, 12), tiny

    def col(j):                                     # (V, 1) coefficient column
        return p[:, j:j + 1]

    u_h = col(0) * x + col(1) * y + col(2) * z + col(3)     # (V, NT)
    v_h = col(4) * x + col(5) * y + col(6) * z + col(7)
    w_h = col(8) * x + col(9) * y + col(10) * z + col(11)

    # Exact reciprocal (approx=False lowers to the full-precision path, not a
    # single EUP vrcp) -- kept exact so px/py stay as close as possible to the
    # reference's u_h / w_h divide feeding round-half-to-even.
    inv_w = pl.reciprocal(w_h, approx=False)
    px = u_h * inv_w
    py = v_h * inv_w

    # torch.round is round-half-to-even; jnp.round matches.
    xi = jnp.clip(jnp.round(px), 0.0, W - 1).astype(jnp.int32)   # (V, NT)
    yi = jnp.clip(jnp.round(py), 0.0, H - 1).astype(jnp.int32)   # (V, NT)

    # Narrow iotas; the comparisons below broadcast them to (W,NT)/(H,NT).
    w_iota = jax.lax.broadcasted_iota(jnp.int32, (W, 1), 0)
    h_iota = jax.lax.broadcasted_iota(jnp.int32, (H, 1), 0)

    # --- data-dependent gather seg[v, yi, xi] per view -----------------------
    # TODO(synk): for production H,W replace the one-hot matmul + masked
    # H-reduce with a true gather (jnp.take on a flattened seg[v]) once its
    # Mosaic lowering is verified on each generation; kept matmul for safety.
    for v in range(V):                              # V is small & static
        xi_v = xi[v:v + 1, :]                       # (1, NT)
        yi_v = yi[v:v + 1, :]
        oh_x = (w_iota == xi_v).astype(seg_ref.dtype)              # (W, NT)
        cols = jnp.dot(seg_ref[v], oh_x,
                       preferred_element_type=acc_dtype)           # (H, NT)
        gathered = jnp.sum(jnp.where(h_iota == yi_v, cols, 0),
                           axis=0, keepdims=True)                  # (1, NT)
        # Per-view row store into f32 scratch (no XLU concat relayout, no
        # packed-int8 single-row masked store).
        res_ref[v:v + 1, :] = gathered.astype(jnp.float32)

    # Single dense (V, NT) store, narrow int8 writeback.
    out_ref[...] = (res_ref[...] != 0.0).astype(jnp.int8)


# ----------------------------------------------------------------------------
# Wrapper
# ----------------------------------------------------------------------------
def _device_kind():
    try:
        return jax.devices()[0].device_kind.lower()
    except Exception:
        return ""


def _gather_operand_dtype(H, W, kind, is_v7):
    """Narrowest dtype for the 0/1 one-hot gather matmul on this generation."""
    if (not is_v7) and ("v5" in kind or "v6" in kind) \
            and H % 32 == 0 and W % 32 == 0:
        return jnp.int8        # int MXU path: ~2x bf16 rate, exact for 0/1
    # TODO(synk): on v7x the MXU has no int path -- use fp8 (e4m3) operands
    # (0/1 exact) once fp8 dot lowering is verified for these shapes.
    return jnp.bfloat16


def projector_forward(point_cloud, img_seg, K, ext_trans, *, n_tile=None):
    B, _, N = point_cloud.shape
    _, V, H, W = img_seg.shape

    kind = _device_kind()
    is_v7 = ("v7" in kind) or ("7x" in kind)

    # Fold intrinsics into extrinsics once on the host: P[b, v] = K @ ext[b, v].
    P = jnp.einsum('ij,bvjk->bvik', K, ext_trans).astype(jnp.float32)  # (B,V,3,4)
    P = P.reshape(B, V, 12)

    # Host-side binarization (binarize-then-gather == gather-then-.bool()),
    # in the narrowest MXU-usable dtype -> 2-4x less seg DMA / VMEM.
    op_dtype = _gather_operand_dtype(H, W, kind, is_v7)
    seg_bin = (img_seg != 0).astype(op_dtype)
    # TODO(synk): for production sizes, zero-pad W to a multiple of 128 on the
    # host (exact for the gather) to remove masked lane tiles / padded MXU K.

    if n_tile is None:
        cap = 2048 if is_v7 else 4096
        n_tile = N if N <= cap else cap
    assert N % n_tile == 0, "N must be divisible by the N tile size"
    num_n_tiles = N // n_tile

    # seg's block index only changes with b; on v7x (64 MiB VMEM) don't burn a
    # second (V,H,W) buffer when seg is large.
    seg_kwargs = {}
    if is_v7 and V * H * W * jnp.dtype(op_dtype).itemsize > (8 << 20):
        seg_kwargs["pipeline_mode"] = pl.Buffered(1)
    seg_spec = pl.BlockSpec((None, V, H, W), lambda b, n: (b, 0, 0, 0),
                            **seg_kwargs)

    vmem_limit = (48 if is_v7 else 96) * 1024 * 1024

    out = pl.pallas_call(
        projector_kernel,
        out_shape=jax.ShapeDtypeStruct((B, V, N), jnp.int8),
        grid=(B, num_n_tiles),                 # n innermost: seg stays resident
        in_specs=[
            pl.BlockSpec((None, V, 12), lambda b, n: (b, 0, 0)),        # P
            pl.BlockSpec((None, 3, n_tile), lambda b, n: (b, 0, n)),    # points
            seg_spec,                                                   # seg
        ],
        out_specs=pl.BlockSpec((None, V, n_tile), lambda b, n: (b, 0, n)),
        scratch_shapes=[pltpu.VMEM((V, n_tile), jnp.float32)],
        compiler_params=pltpu.CompilerParams(
            dimension_semantics=("parallel", "parallel"),
            vmem_limit_bytes=vmem_limit,
        ),
    )(P, point_cloud.astype(jnp.float32), seg_bin)

    # Boolean output dtype (torch .bool()) — cheap cast outside the kernel.
    return out.astype(jnp.bool_)


if __name__ == "__main__":
    B, V, N, H, W = 2, 4, 256, 16, 16

    # Projector.__init__(batch_size=B, fov=25, img_width=W, img_height=H)
    K_np, ext_np = init_camera_config(batch_size=B, fov=25,
                                      img_width=W, img_height=H)
    K = jnp.asarray(K_np)                               # (3, 3)
    ext_trans = jnp.asarray(ext_np)                     # (B, 4, 3, 4)

    key = jax.random.PRNGKey(0)
    k1, k2 = jax.random.split(key)
    # points near the origin so the projections land inside the image
    point_cloud = jax.random.uniform(k1, (B, 3, N), jnp.float32, -0.5, 0.5)
    img_seg = jax.random.bernoulli(k2, 0.5, (B, V, H, W)).astype(jnp.float32)

    masks = projector_forward(point_cloud, img_seg, K, ext_trans)
    jax.block_until_ready(masks)

    assert masks.shape == (B, V, N)
    assert masks.dtype == jnp.bool_
    print("KERNEL_OK")
</pallas_src>

<mosaic_0001>
module attributes {stable_mosaic.version = 11 : i64} {
  func.func @projector_kernel(%arg0: i32, %arg1: i32, %arg2: memref<1x4x12xf32, #tpu.memory_space<vmem>>, %arg3: memref<1x3x256xf32, #tpu.memory_space<vmem>>, %arg4: memref<1x4x16x16xbf16, #tpu.memory_space<vmem>>, %arg5: memref<1x4x256xi8, #tpu.memory_space<vmem>>, %arg6: memref<4x256xf32, #tpu.memory_space<vmem>>) attributes {dimension_semantics = [#tpu.dimension_semantics<parallel>, #tpu.dimension_semantics<parallel>], iteration_bounds = array<i64: 2, 1>, scalar_prefetch = 0 : i64, scratch_operands = 1 : i64, tpu.core_type = #tpu.core_type<tc>, window_params = [{transform_indices = @transform_0, window_bounds = array<i64: 1, 4, 12>}, {transform_indices = @transform_1, window_bounds = array<i64: 1, 3, 256>}, {transform_indices = @transform_2, window_bounds = array<i64: 1, 4, 16, 16>}, {transform_indices = @transform_3, window_bounds = array<i64: 1, 4, 256>}]} {
    %c0 = arith.constant 0 : index
    %c0_0 = arith.constant 0 : index
    %c0_1 = arith.constant 0 : index
    %0 = vector.load %arg3[%c0, %c0_0, %c0_1] : memref<1x3x256xf32, #tpu.memory_space<vmem>>, vector<1x1x256xf32>
    %1 = vector.shape_cast %0 : vector<1x1x256xf32> to vector<1x256xf32>
    %c0_2 = arith.constant 0 : index
    %c1 = arith.constant 1 : index
    %c0_3 = arith.constant 0 : index
    %2 = vector.load %arg3[%c0_2, %c1, %c0_3] : memref<1x3x256xf32, #tpu.memory_space<vmem>>, vector<1x1x256xf32>
    %3 = vector.shape_cast %2 : vector<1x1x256xf32> to vector<1x256xf32>
    %c0_4 = arith.constant 0 : index
    %c2 = arith.constant 2 : index
    %c0_5 = arith.constant 0 : index
    %4 = vector.load %arg3[%c0_4, %c2, %c0_5] : memref<1x3x256xf32, #tpu.memory_space<vmem>>, vector<1x1x256xf32>
    %5 = vector.shape_cast %4 : vector<1x1x256xf32> to vector<1x256xf32>
    %c0_6 = arith.constant 0 : index
    %c0_7 = arith.constant 0 : index
    %c0_8 = arith.constant 0 : index
    %6 = vector.load %arg2[%c0_6, %c0_7, %c0_8] : memref<1x4x12xf32, #tpu.memory_space<vmem>>, vector<1x4x12xf32>
    %7 = vector.shape_cast %6 : vector<1x4x12xf32> to vector<4x12xf32>
    %8 = vector.extract_strided_slice %7 {offsets = [0, 0], sizes = [4, 1], strides = [1, 1]} : vector<4x12xf32> to vector<4x1xf32>
    %9 = vector.broadcast %8 : vector<4x1xf32> to vector<4x256xf32>
    %10 = vector.broadcast %1 : vector<1x256xf32> to vector<4x256xf32>
    %11 = arith.mulf %9, %10 : vector<4x256xf32>
    %12 = vector.extract_strided_slice %7 {offsets = [0, 1], sizes = [4, 1], strides = [1, 1]} : vector<4x12xf32> to vector<4x1xf32>
    %13 = vector.broadcast %12 : vector<4x1xf32> to vector<4x256xf32>
    %14 = vector.broadcast %3 : vector<1x256xf32> to vector<4x256xf32>
    %15 = arith.mulf %13, %14 : vector<4x256xf32>
    %16 = arith.addf %11, %15 : vector<4x256xf32>
    %17 = vector.extract_strided_slice %7 {offsets = [0, 2], sizes = [4, 1], strides = [1, 1]} : vector<4x12xf32> to vector<4x1xf32>
    %18 = vector.broadcast %17 : vector<4x1xf32> to vector<4x256xf32>
    %19 = vector.broadcast %5 : vector<1x256xf32> to vector<4x256xf32>
    %20 = arith.mulf %18, %19 : vector<4x256xf32>
    %21 = arith.addf %16, %20 : vector<4x256xf32>
    %22 = vector.extract_strided_slice %7 {offsets = [0, 3], sizes = [4, 1], strides = [1, 1]} : vector<4x12xf32> to vector<4x1xf32>
    %23 = vector.broadcast %22 : vector<4x1xf32> to vector<4x256xf32>
    %24 = arith.addf %21, %23 : vector<4x256xf32>
    %25 = vector.extract_strided_slice %7 {offsets = [0, 4], sizes = [4, 1], strides = [1, 1]} : vector<4x12xf32> to vector<4x1xf32>
    %26 = vector.broadcast %25 : vector<4x1xf32> to vector<4x256xf32>
    %27 = vector.broadcast %1 : vector<1x256xf32> to vector<4x256xf32>
    %28 = arith.mulf %26, %27 : vector<4x256xf32>
    %29 = vector.extract_strided_slice %7 {offsets = [0, 5], sizes = [4, 1], strides = [1, 1]} : vector<4x12xf32> to vector<4x1xf32>
    %30 = vector.broadcast %29 : vector<4x1xf32> to vector<4x256xf32>
    %31 = vector.broadcast %3 : vector<1x256xf32> to vector<4x256xf32>
    %32 = arith.mulf %30, %31 : vector<4x256xf32>
    %33 = arith.addf %28, %32 : vector<4x256xf32>
    %34 = vector.extract_strided_slice %7 {offsets = [0, 6], sizes = [4, 1], strides = [1, 1]} : vector<4x12xf32> to vector<4x1xf32>
    %35 = vector.broadcast %34 : vector<4x1xf32> to vector<4x256xf32>
    %36 = vector.broadcast %5 : vector<1x256xf32> to vector<4x256xf32>
    %37 = arith.mulf %35, %36 : vector<4x256xf32>
    %38 = arith.addf %33, %37 : vector<4x256xf32>
    %39 = vector.extract_strided_slice %7 {offsets = [0, 7], sizes = [4, 1], strides = [1, 1]} : vector<4x12xf32> to vector<4x1xf32>
    %40 = vector.broadcast %39 : vector<4x1xf32> to vector<4x256xf32>
    %41 = arith.addf %38, %40 : vector<4x256xf32>
    %42 = vector.extract_strided_slice %7 {offsets = [0, 8], sizes = [4, 1], strides = [1, 1]} : vector<4x12xf32> to vector<4x1xf32>
    %43 = vector.broadcast %42 : vector<4x1xf32> to vector<4x256xf32>
    %44 = vector.broadcast %1 : vector<1x256xf32> to vector<4x256xf32>
    %45 = arith.mulf %43, %44 : vector<4x256xf32>
    %46 = vector.extract_strided_slice %7 {offsets = [0, 9], sizes = [4, 1], strides = [1, 1]} : vector<4x12xf32> to vector<4x1xf32>
    %47 = vector.broadcast %46 : vector<4x1xf32> to vector<4x256xf32>
    %48 = vector.broadcast %3 : vector<1x256xf32> to vector<4x256xf32>
    %49 = arith.mulf %47, %48 : vector<4x256xf32>
    %50 = arith.addf %45, %49 : vector<4x256xf32>
    %51 = vector.extract_strided_slice %7 {offsets = [0, 10], sizes = [4, 1], strides = [1, 1]} : vector<4x12xf32> to vector<4x1xf32>
    %52 = vector.broadcast %51 : vector<4x1xf32> to vector<4x256xf32>
    %53 = vector.broadcast %5 : vector<1x256xf32> to vector<4x256xf32>
    %54 = arith.mulf %52, %53 : vector<4x256xf32>
    %55 = arith.addf %50, %54 : vector<4x256xf32>
    %56 = vector.extract_strided_slice %7 {offsets = [0, 11], sizes = [4, 1], strides = [1, 1]} : vector<4x12xf32> to vector<4x1xf32>
    %57 = vector.broadcast %56 : vector<4x1xf32> to vector<4x256xf32>
    %58 = arith.addf %55, %57 : vector<4x256xf32>
    %59 = tpu.reciprocal %58 : vector<4x256xf32> -> vector<4x256xf32>
    %60 = arith.mulf %24, %59 : vector<4x256xf32>
    %61 = arith.mulf %41, %59 : vector<4x256xf32>
    %62 = math.roundeven %60 : vector<4x256xf32>
    %cst = arith.constant 0.000000e+00 : f32
    %c15_i32 = arith.constant 15 : i32
    %63 = vector.broadcast %cst : f32 to vector<4x256xf32>
    %64 = arith.maximumf %63, %62 : vector<4x256xf32>
    %65 = arith.sitofp %c15_i32 : i32 to f32
    %66 = vector.broadcast %65 : f32 to vector<4x256xf32>
    %67 = arith.minimumf %66, %64 : vector<4x256xf32>
    %68 = arith.fptosi %67 : vector<4x256xf32> to vector<4x256xi32>
    %69 = math.roundeven %61 : vector<4x256xf32>
    %cst_9 = arith.constant 0.000000e+00 : f32
    %c15_i32_10 = arith.constant 15 : i32
    %70 = vector.broadcast %cst_9 : f32 to vector<4x256xf32>
    %71 = arith.maximumf %70, %69 : vector<4x256xf32>
    %72 = arith.sitofp %c15_i32_10 : i32 to f32
    %73 = vector.broadcast %72 : f32 to vector<4x256xf32>
    %74 = arith.minimumf %73, %71 : vector<4x256xf32>
    %75 = arith.fptosi %74 : vector<4x256xf32> to vector<4x256xi32>
    %76 = tpu.iota {dimensions = array<i32: 0>} : vector<16x1xi32>
    %77 = tpu.iota {dimensions = array<i32: 0>} : vector<16x1xi32>
    %78 = vector.extract_strided_slice %68 {offsets = [0, 0], sizes = [1, 256], strides = [1, 1]} : vector<4x256xi32> to vector<1x256xi32>
    %79 = vector.extract_strided_slice %75 {offsets = [0, 0], sizes = [1, 256], strides = [1, 1]} : vector<4x256xi32> to vector<1x256xi32>
    %80 = vector.broadcast %76 : vector<16x1xi32> to vector<16x256xi32>
    %81 = vector.broadcast %78 : vector<1x256xi32> to vector<16x256xi32>
    %82 = arith.cmpi eq, %80, %81 : vector<16x256xi32>
    %83 = arith.extui %82 : vector<16x256xi1> to vector<16x256xi32>
    %84 = arith.sitofp %83 : vector<16x256xi32> to vector<16x256xf32>
    %85 = arith.truncf %84 : vector<16x256xf32> to vector<16x256xbf16>
    %c0_11 = arith.constant 0 : index
    %c0_12 = arith.constant 0 : index
    %c0_13 = arith.constant 0 : index
    %c0_14 = arith.constant 0 : index
    %86 = vector.load %arg4[%c0_11, %c0_12, %c0_13, %c0_14] : memref<1x4x16x16xbf16, #tpu.memory_space<vmem>>, vector<1x1x16x16xbf16>
    %87 = vector.shape_cast %86 : vector<1x1x16x16xbf16> to vector<16x16xbf16>
    %cst_15 = arith.constant dense<0.000000e+00> : vector<16x256xf32>
    %88 = tpu.matmul %87, %85, %cst_15 {dimension_numbers = #tpu.dot_dimension_numbers<[1], [0], [0], [1], [0, 0, 1, 1], [], []>} : vector<16x16xbf16>, vector<16x256xbf16>, vector<16x256xf32> -> vector<16x256xf32>
    %89 = vector.broadcast %77 : vector<16x1xi32> to vector<16x256xi32>
    %90 = vector.broadcast %79 : vector<1x256xi32> to vector<16x256xi32>
    %91 = arith.cmpi eq, %89, %90 : vector<16x256xi32>
    %c0_i32 = arith.constant 0 : i32
    %92 = arith.sitofp %c0_i32 : i32 to f32
    %93 = vector.broadcast %92 : f32 to vector<16x256xf32>
    %94 = arith.select %91, %88, %93 : vector<16x256xi1>, vector<16x256xf32>
    %cst_16 = arith.constant dense<0.000000e+00> : vector<256xf32>
    %95 = vector.multi_reduction <add>, %94, %cst_16 [0] : vector<16x256xf32> to vector<256xf32>
    %96 = vector.shape_cast %95 : vector<256xf32> to vector<1x256xf32>
    %c0_17 = arith.constant 0 : index
    %c0_18 = arith.constant 0 : index
    %97 = vector.load %arg6[%c0_17, %c0_18] : memref<4x256xf32, #tpu.memory_space<vmem>>, vector<1x256xf32>
    tpu.vector_store %arg6[%c0_17, %c0_18], %96 {strides = array<i32>} : memref<4x256xf32, #tpu.memory_space<vmem>>, vector<1x256xf32>,
    %98 = vector.extract_strided_slice %68 {offsets = [1, 0], sizes = [1, 256], strides = [1, 1]} : vector<4x256xi32> to vector<1x256xi32>
    %99 = vector.extract_strided_slice %75 {offsets = [1, 0], sizes = [1, 256], strides = [1, 1]} : vector<4x256xi32> to vector<1x256xi32>
    %100 = vector.broadcast %76 : vector<16x1xi32> to vector<16x256xi32>
    %101 = vector.broadcast %98 : vector<1x256xi32> to vector<16x256xi32>
    %102 = arith.cmpi eq, %100, %101 : vector<16x256xi32>
    %103 = arith.extui %102 : vector<16x256xi1> to vector<16x256xi32>
    %104 = arith.sitofp %103 : vector<16x256xi32> to vector<16x256xf32>
    %105 = arith.truncf %104 : vector<16x256xf32> to vector<16x256xbf16>
    %c0_19 = arith.constant 0 : index
    %c1_20 = arith.constant 1 : index
    %c0_21 = arith.constant 0 : index
    %c0_22 = arith.constant 0 : index
    %106 = vector.load %arg4[%c0_19, %c1_20, %c0_21, %c0_22] : memref<1x4x16x16xbf16, #tpu.memory_space<vmem>>, vector<1x1x16x16xbf16>
    %107 = vector.shape_cast %106 : vector<1x1x16x16xbf16> to vector<16x16xbf16>
    %cst_23 = arith.constant dense<0.000000e+00> : vector<16x256xf32>
    %108 = tpu.matmul %107, %105, %cst_23 {dimension_numbers = #tpu.dot_dimension_numbers<[1], [0], [0], [1], [0, 0, 1, 1], [], []>} : vector<16x16xbf16>, vector<16x256xbf16>, vector<16x256xf32> -> vector<16x256xf32>
    %109 = vector.broadcast %77 : vector<16x1xi32> to vector<16x256xi32>
    %110 = vector.broadcast %99 : vector<1x256xi32> to vector<16x256xi32>
    %111 = arith.cmpi eq, %109, %110 : vector<16x256xi32>
    %c0_i32_24 = arith.constant 0 : i32
    %112 = arith.sitofp %c0_i32_24 : i32 to f32
    %113 = vector.broadcast %112 : f32 to vector<16x256xf32>
    %114 = arith.select %111, %108, %113 : vector<16x256xi1>, vector<16x256xf32>
    %cst_25 = arith.constant dense<0.000000e+00> : vector<256xf32>
    %115 = vector.multi_reduction <add>, %114, %cst_25 [0] : vector<16x256xf32> to vector<256xf32>
    %116 = vector.shape_cast %115 : vector<256xf32> to vector<1x256xf32>
    %c1_26 = arith.constant 1 : index
    %c0_27 = arith.constant 0 : index
    %117 = vector.load %arg6[%c1_26, %c0_27] : memref<4x256xf32, #tpu.memory_space<vmem>>, vector<1x256xf32>
    tpu.vector_store %arg6[%c1_26, %c0_27], %116 {strides = array<i32>} : memref<4x256xf32, #tpu.memory_space<vmem>>, vector<1x256xf32>,
    %118 = vector.extract_strided_slice %68 {offsets = [2, 0], sizes = [1, 256], strides = [1, 1]} : vector<4x256xi32> to vector<1x256xi32>
    %119 = vector.extract_strided_slice %75 {offsets = [2, 0], sizes = [1, 256], strides = [1, 1]} : vector<4x256xi32> to vector<1x256xi32>
    %120 = vector.broadcast %76 : vector<16x1xi32> to vector<16x256xi32>
    %121 = vector.broadcast %118 : vector<1x256xi32> to vector<16x256xi32>
    %122 = arith.cmpi eq, %120, %121 : vector<16x256xi32>
    %123 = arith.extui %122 : vector<16x256xi1> to vector<16x256xi32>
    %124 = arith.sitofp %123 : vector<16x256xi32> to vector<16x256xf32>
    %125 = arith.truncf %124 : vector<16x256xf32> to vector<16x256xbf16>
    %c0_28 = arith.constant 0 : index
    %c2_29 = arith.constant 2 : index
    %c0_30 = arith.constant 0 : index
    %c0_31 = arith.constant 0 : index
    %126 = vector.load %arg4[%c0_28, %c2_29, %c0_30, %c0_31] : memref<1x4x16x16xbf16, #tpu.memory_space<vmem>>, vector<1x1x16x16xbf16>
    %127 = vector.shape_cast %126 : vector<1x1x16x16xbf16> to vector<16x16xbf16>
    %cst_32 = arith.constant dense<0.000000e+00> : vector<16x256xf32>
    %128 = tpu.matmul %127, %125, %cst_32 {dimension_numbers = #tpu.dot_dimension_numbers<[1], [0], [0], [1], [0, 0, 1, 1], [], []>} : vector<16x16xbf16>, vector<16x256xbf16>, vector<16x256xf32> -> vector<16x256xf32>
    %129 = vector.broadcast %77 : vector<16x1xi32> to vector<16x256xi32>
    %130 = vector.broadcast %119 : vector<1x256xi32> to vector<16x256xi32>
    %131 = arith.cmpi eq, %129, %130 : vector<16x256xi32>
    %c0_i32_33 = arith.constant 0 : i32
    %132 = arith.sitofp %c0_i32_33 : i32 to f32
    %133 = vector.broadcast %132 : f32 to vector<16x256xf32>
    %134 = arith.select %131, %128, %133 : vector<16x256xi1>, vector<16x256xf32>
    %cst_34 = arith.constant dense<0.000000e+00> : vector<256xf32>
    %135 = vector.multi_reduction <add>, %134, %cst_34 [0] : vector<16x256xf32> to vector<256xf32>
    %136 = vector.shape_cast %135 : vector<256xf32> to vector<1x256xf32>
    %c2_35 = arith.constant 2 : index
    %c0_36 = arith.constant 0 : index
    %137 = vector.load %arg6[%c2_35, %c0_36] : memref<4x256xf32, #tpu.memory_space<vmem>>, vector<1x256xf32>
    tpu.vector_store %arg6[%c2_35, %c0_36], %136 {strides = array<i32>} : memref<4x256xf32, #tpu.memory_space<vmem>>, vector<1x256xf32>,
    %138 = vector.extract_strided_slice %68 {offsets = [3, 0], sizes = [1, 256], strides = [1, 1]} : vector<4x256xi32> to vector<1x256xi32>
    %139 = vector.extract_strided_slice %75 {offsets = [3, 0], sizes = [1, 256], strides = [1, 1]} : vector<4x256xi32> to vector<1x256xi32>
    %140 = vector.broadcast %76 : vector<16x1xi32> to vector<16x256xi32>
    %141 = vector.broadcast %138 : vector<1x256xi32> to vector<16x256xi32>
    %142 = arith.cmpi eq, %140, %141 : vector<16x256xi32>
    %143 = arith.extui %142 : vector<16x256xi1> to vector<16x256xi32>
    %144 = arith.sitofp %143 : vector<16x256xi32> to vector<16x256xf32>
    %145 = arith.truncf %144 : vector<16x256xf32> to vector<16x256xbf16>
    %c0_37 = arith.constant 0 : index
    %c3 = arith.constant 3 : index
    %c0_38 = arith.constant 0 : index
    %c0_39 = arith.constant 0 : index
    %146 = vector.load %arg4[%c0_37, %c3, %c0_38, %c0_39] : memref<1x4x16x16xbf16, #tpu.memory_space<vmem>>, vector<1x1x16x16xbf16>
    %147 = vector.shape_cast %146 : vector<1x1x16x16xbf16> to vector<16x16xbf16>
    %cst_40 = arith.constant dense<0.000000e+00> : vector<16x256xf32>
    %148 = tpu.matmul %147, %145, %cst_40 {dimension_numbers = #tpu.dot_dimension_numbers<[1], [0], [0], [1], [0, 0, 1, 1], [], []>} : vector<16x16xbf16>, vector<16x256xbf16>, vector<16x256xf32> -> vector<16x256xf32>
    %149 = vector.broadcast %77 : vector<16x1xi32> to vector<16x256xi32>
    %150 = vector.broadcast %139 : vector<1x256xi32> to vector<16x256xi32>
    %151 = arith.cmpi eq, %149, %150 : vector<16x256xi32>
    %c0_i32_41 = arith.constant 0 : i32
    %152 = arith.sitofp %c0_i32_41 : i32 to f32
    %153 = vector.broadcast %152 : f32 to vector<16x256xf32>
    %154 = arith.select %151, %148, %153 : vector<16x256xi1>, vector<16x256xf32>
    %cst_42 = arith.constant dense<0.000000e+00> : vector<256xf32>
    %155 = vector.multi_reduction <add>, %154, %cst_42 [0] : vector<16x256xf32> to vector<256xf32>
    %156 = vector.shape_cast %155 : vector<256xf32> to vector<1x256xf32>
    %c3_43 = arith.constant 3 : index
    %c0_44 = arith.constant 0 : index
    %157 = vector.load %arg6[%c3_43, %c0_44] : memref<4x256xf32, #tpu.memory_space<vmem>>, vector<1x256xf32>
    tpu.vector_store %arg6[%c3_43, %c0_44], %156 {strides = array<i32>} : memref<4x256xf32, #tpu.memory_space<vmem>>, vector<1x256xf32>,
    %c0_45 = arith.constant 0 : index
    %c0_46 = arith.constant 0 : index
    %158 = vector.load %arg6[%c0_45, %c0_46] : memref<4x256xf32, #tpu.memory_space<vmem>>, vector<4x256xf32>
    %cst_47 = arith.constant 0.000000e+00 : f32
    %159 = vector.broadcast %cst_47 : f32 to vector<4x256xf32>
    %160 = arith.cmpf one, %158, %159 : vector<4x256xf32>
    %161 = arith.extui %160 : vector<4x256xi1> to vector<4x256xi8>
    %c0_48 = arith.constant 0 : index
    %c0_49 = arith.constant 0 : index
    %c0_50 = arith.constant 0 : index
    %162 = vector.load %arg5[%c0_48, %c0_49, %c0_50] : memref<1x4x256xi8, #tpu.memory_space<vmem>>, vector<1x4x256xi8>
    %163 = vector.shape_cast %162 : vector<1x4x256xi8> to vector<4x256xi8>
    %164 = vector.shape_cast %161 : vector<4x256xi8> to vector<1x4x256xi8>
    tpu.vector_store %arg5[%c0_48, %c0_49, %c0_50], %164 {strides = array<i32>} : memref<1x4x256xi8, #tpu.memory_space<vmem>>, vector<1x4x256xi8>,
    return
  }
  func.func @transform_0(%arg0: i32, %arg1: i32) -> (i32, i32, i32) {
    %c0_i32 = arith.constant 0 : i32
    %c0_i32_0 = arith.constant 0 : i32
    %c0_i32_1 = arith.constant 0 : i32
    return %arg0, %c0_i32, %c0_i32_0 : i32, i32, i32
  }
  func.func @transform_1(%arg0: i32, %arg1: i32) -> (i32, i32, i32) {
    %c0_i32 = arith.constant 0 : i32
    %c0_i32_0 = arith.constant 0 : i32
    return %arg0, %c0_i32, %arg1 : i32, i32, i32
  }
  func.func @transform_2(%arg0: i32, %arg1: i32) -> (i32, i32, i32, i32) {
    %c0_i32 = arith.constant 0 : i32
    %c0_i32_0 = arith.constant 0 : i32
    %c0_i32_1 = arith.constant 0 : i32
    %c0_i32_2 = arith.constant 0 : i32
    return %arg0, %c0_i32, %c0_i32_0, %c0_i32_1 : i32, i32, i32, i32
  }
  func.func @transform_3(%arg0: i32, %arg1: i32) -> (i32, i32, i32) {
    %c0_i32 = arith.constant 0 : i32
    %c0_i32_0 = arith.constant 0 : i32
    return %arg0, %c0_i32, %arg1 : i32, i32, i32
  }
}

</mosaic_0001>

<bundles_post_ra>
// kernel: tpu_custom_call.1
= control target key start
LH: loop header
LB: loop body
LE: loop exit
PB: predicated region body
PF: predicated region fallthrough
CT: control target
= control target key end

     0   :  { %8 = vsyncpa [#allocation4], 0  ;;  %s1745_s0 = inlined_call_operand.vmem [shape: f32[2,4,12], index: 0, kind: input, shape index: {}]   ;;  %s1746_s1 = inlined_call_operand.vmem [shape: f32[2,3,256], index: 1, kind: input, shape index: {}]   ;;  %s1747_s2 = inlined_call_operand.hbm [shape: bf16[2,4,16,16], index: 2, kind: input, shape index: {}]   ;;  %s1748_s3 = inlined_call_operand.hbm [shape: s8[2,4,256], index: 3, kind: output, shape index: {}]  }
   0x1   :  { %10 = vsyncpa [#allocation4 + $0x1], 0 }
   0x2   :  { %11 = vsyncpa [#allocation5], 0 }
   0x3   :  { %13 = vsyncpa [#allocation5 + $0x1], 0  ;;  %s1434_s12 = smov 0   ;;  %s1436_s13 = smov 0  }
   0x4   :  { %s1438_s14 = smov 0   ;;  %s1440_s15 = smov 0  }
   0x5   :  { %s1442_s16 = smov 0   ;;  %s1444_s17 = smov 0  }
   0x6 LB: > { %s1093_s18 = sadd.s32 4294967295, %s1394_s17   ;;  %s1094_s19 = sadd.s32 4294967294, %s1394_s17   ;;  %s1394_s17 = sphi %s1444_s17, %s19_s17   ;;  %s1390_s16 = sphi %s1442_s16, %s1761_s16   ;;  %s1386_s15 = sphi %s1440_s15, %s1760_s15   ;;  %s1382_s14 = sphi %s1438_s14, %s1759_s14   ;;  %s1378_s13 = sphi %s1436_s13, %s1758_s13   ;;  %s1374_s12 = sphi %s1434_s12, %s1757_s12  }
   0x7   : > { %s31_s20 = sadd.s32 1, %s1390_s16  ;;  %s92_s21 = sadd.s32 1, %s1382_s14 }
   0x8   : > { %p33_p0 = scmp.ge.s32.totalorder %s31_s20, 2  ;;  %p99_p1 = scmp.ne.s32.totalorder %s1382_s14, %s1378_s13 }
   0x9   : > { %p100_p2 = scmp.eq.s32.totalorder %s1394_s17, 0  ;;  %p105_p3 = scmp.ne.s32.totalorder %s1378_s13, %s1374_s12 }
   0xa   : > { %s1763_s20 = smov (%p33_p0, %s31_s20), 0  ;;  %p106_p5 = scmp.eq.s32.totalorder %s1093_s18, 0 }
   0xb   : > { %p1475_p4 = por %p100_p2, %p99_p1  ;;  %s89_s23 = ssub.s32 %s1390_s16, %s1763_s20 }
   0xc   : > { %p131_p6 = scmp.eq.s32.totalorder %s1093_s18, 1  ;;  %p90_p7 = scmp.eq.s32.totalorder %s89_s23, 0 }
   0xd   : > { %p1481_p8 = por %p106_p5, %p105_p3  ;;  %p137_p10 = scmp.eq.s32.totalorder %s1094_s19, 1 }
   0xe   : > { %p1485_p9 = por %p131_p6, %p99_p1  ;;  %p1199_p13 = scmp.lt.s32.totalorder %s1394_s17, 2 }
   0xf   : > { %s1490_s26 = scalar_select %p90_p7, %s1382_s14, %s92_s21  }
  0x10   : > { %p1492_p11 = por %p137_p10, %p105_p3  ;;  %s177_s28 = sand.u32 1, %s1382_s14  }
  0x11   : > { %s1097_s29 = sshll.u32 %s177_s28, 5  ;;  %s1172_s30 = sshll.u32 %s1390_s16, 9 }
  0x12   : > { %s187_s6 = scalar_lea.hbm %s1747_s2, %s1172_s30  ;;  %s181_s7 = scalar_lea.vmem [#allocation3], %s1097_s29 }
  0x13   : > { %s188_s8 = sshll.u32 %s181_s7, 4  ;;  %p1505_p0 = pnand %p1199_p13, %p1475_p4  ;;  %s189_s8 = int_to_ptr.vmem [resolvable:$true] %s188_s8 }
  0x14   : > { %p1100_p1 = scmp.ge.s32.totalorder %s1394_s17, 1  ;;  %s178_s10 = scalar_lea.sflag [#allocation4], %s177_s28 }
  0x15   : > { %p1288_p2 = pneg %p1505_p0  ;;  %s1299_s11 = scalar_lea.vmem %s189_s8, 512 }
  0x16   : > { %p1300_p3 = scmp.ne.s32.totalorder %s189_s8, %s1299_s11  ;;  %s1396_s18 = smov [#allocation3]  }
  0x17   : > { %s1304_s19 = sshll.u32 %s1396_s18, 4  ;;  %s1305_s19 = int_to_ptr.vmem [resolvable:$false] %s1304_s19 }
  0x18   : > { %p1302_p5 = pnand %p1300_p3, %p1288_p2  ;;  %s1306_s21 = scalar_lea.vmem %s1305_s19, 1024 }
  0x19   : > { %p1307_p7 = scmp.lt.s32.totalorder %s189_s8, %s1305_s19  ;;  %p1308_p10 = scmp.lt.s32.totalorder %s1306_s21, %s1299_s11 }
  0x1a   : > { %p1303_p6 = pneg %p1302_p5 }
  0x1b   : > { %p1309_p12 = por %p1308_p10, %p1307_p7 }
  0x1d   : > { %p1310_p4 = pnand %p1309_p12, %p1303_p6 }
  0x1f   : > { %1313 = shalt.err (!%p1310_p4)
}
  0x20   : > { %s1397_s22 = smov 64   ;;  %s1398_s23 = smov 4  }
  0x21   : > { %1194 = dma.hbm_to_vmem [thread:$0]  (!%p1505_p0), %s187_s6, 512, %s189_s8, %s178_s10, %s1397_s22, %s1397_s22, %s1398_s23  }
  0x22   : > { %p196_p13 = scmp.lt.s32.totalorder %s1394_s17, 3 }
  0x24   : > { %p197_p2 = pnand %p1100_p1, %p196_p13 }
  0x25   : > { %s1518_s28 = sand.u32 (!%p197_p2), 1, %s1378_s13  }
  0x26   : > { %200 = sbr.rel (%p197_p2) target bundleno = 490 (0x1ea), region = 32  ;;  %s1101_s29 = sshll.u32 (!%p197_p2), %s1518_s28, 5 }
  0x27   : > { %s203_s30 = scalar_lea.sflag (!%p197_p2), [#allocation4], %s1518_s28  ;;  %s1522_s4 = scalar_lea.vmem (!%p197_p2), [#allocation3], %s1101_s29 }
  0x2b   : > { %1365 = dma.done.wait (%p1481_p8), %s203_s30, 512  }
  0x2c   : > { %1367 = vsyncadd (%p1481_p8), %s203_s30, 4294966784  ;;  %p242_p12 = scmp.lt.s32.totalorder %s1386_s15, 1  ;;  %v1399_v0 = vmov 10   ;;  %v1400_v1 = vmov 8   ;;  %v1401_v2 = vmov 0   ;;  %v1402_v4 = vmov 11  }
  0x2d   : > { %1267 = vset.pattern.permute.xlu1 %v1399_v0  ;;  %1265 = vset.pattern.permute.xlu0 %v1400_v1  ;;  %v1403_v5 = vmov 9   ;;  %v1404_v6 = vmov 1   ;;  %v1405_v7 = vmov 2   ;;  %v1406_v8 = vmov 4   ;;  %s1102_s19 = sshll.u32 %s1518_s28, 1  ;;  %s1174_s21 = sshll.u32 %s1386_s15, 5 }
  0x2e   : > { %s1530_s5 = scalar_select %p242_p12, %s1386_s15, 1  ;;  %474 = vmatprep.mubr.bf16.mxu0 %v1401_v2  ;;  %603 = vmatprep.mubr.bf16.mxu1 %v1401_v2  ;;  %v1407_v9 = vmov 3   ;;  %v1408_v10 = vmov 7   ;;  %v1409_v11 = vmov 5   ;;  %v1410_v12 = vmov 6  }
  0x2f   : > { %v272_v13 = vlaneseq  ;;  %s241_s22 = scalar_lea.vmem [#allocation6], %s1102_s19  ;;  %s1413_s7 = smov [#allocation6]  }
  0x30   : > { %s1103_s6 = sshll.u32 %s1530_s5, 2  ;;  %s1173_s9 = sshll.u32 %s1530_s5, 3 }
  0x31   : > { %s245_s24 = scalar_lea.vmem %s1745_s0, %s1103_s6  ;;  %v1541_v14 = vshrl.u32 %v272_v13, 7  ;;  %s254_s18 = scalar_lea.vmem %s1746_s1, %s1173_s9 }
  0x32   : > { %v265_v3 = vld [vmem:[%s245_s24] sm:$0xf]  ;;  %s982_s23 = sshll.u32 %s241_s22, 4  ;;  %s966_s5 = scalar_lea.sflag [#allocation5], %s1518_s28  ;;  %s983_s23 = int_to_ptr.vmem [resolvable:$true] %s982_s23 }
  0x33   : > { %371 = vperm.xlu1 %1267, %v265_v3   ;;  %357 = vperm.xlu0 %1265, %v265_v3   ;;  %v1547_v15 = vsub.s32 0, %v1541_v14  ;;  %v1550_v16 = vsub.s32 1, %v1541_v14  ;;  %v260_v17 = vld [vmem:[%s254_s18] ss:$4 sm:$0x3]  ;;  %s1314_s6 = scalar_lea.vmem %s983_s23, 32 }
  0x34   : > { %v1106_v18 = vld [vmem:[%s254_s18 + $0x1] ss:$4 sm:$0x3]  ;;  %v1107_v21 = vld [vmem:[%s254_s18 + $0x2] ss:$4 sm:$0x3]  ;;  %p1315_p8 = scmp.ne.s32.totalorder %s983_s23, %s1314_s6 }
  0x35   : > { %v275_v22 = vrot.slane %v260_v17, %v1547_v15  ;;  %v279_v23 = vrot.slane %v260_v17, %v1550_v16  ;;  %v292_v24 = vrot.slane %v1106_v18, %v1547_v15  ;;  %v296_v25 = vrot.slane %v1106_v18, %v1550_v16  ;;  %s1318_s8 = sshll.u32 %s1413_s7, 4  ;;  %s1319_s8 = int_to_ptr.vmem [resolvable:$false] %s1318_s8 }
  0x36   : > { %v311_v26 = vrot.slane %v1107_v21, %v1547_v15  ;;  %v315_v27 = vrot.slane %v1107_v21, %v1550_v16  ;;  %v1559_v18 = vsub.s32 2, %v1541_v14  ;;  %p1316_p0 = pnand %p1315_p8, %p1485_p9  ;;  %s1320_s15 = scalar_lea.vmem %s1319_s8, 64 }
  0x37   : > { %1268 = vset.pattern.permute.xlu1 %v1402_v4  ;;  %1266 = vset.pattern.permute.xlu0 %v1403_v5  ;;  %p1321_p3 = scmp.lt.s32.totalorder %s983_s23, %s1319_s8  ;;  %p1322_p5 = scmp.lt.s32.totalorder %s1320_s15, %s1314_s6 }
  0x38   : > { %379 = vperm.xlu1 %1268, %v265_v3   ;;  %363 = vperm.xlu0 %1266, %v265_v3   ;;  %p1317_p1 = pneg %p1316_p0 }
  0x39   : > { %p1323_p6 = por %p1322_p5, %p1321_p3 }
  0x3b   : > { %p1324_p7 = pnand %p1323_p6, %p1317_p1 }
  0x3c   : > { %1269 = vset.pattern.permute.xlu1 %v1401_v2  ;;  %1270 = vset.pattern.permute.xlu0 %v1404_v6 }
  0x3d   : > { %268 = vperm.xlu1 %1269, %v265_v3   ;;  %285 = vperm.xlu0 %1270, %v265_v3  }
  0x41   : > { %1271 = vset.pattern.permute.xlu1 %v1405_v7  ;;  %1273 = vset.pattern.permute.xlu0 %v1406_v8 }
  0x42   : > { %304 = vperm.xlu1 %1271, %v265_v3   ;;  %329 = vperm.xlu0 %1273, %v265_v3  }
  0x46   : > { %1272 = vset.pattern.permute.xlu1 %v1407_v9  ;;  %1276 = vset.pattern.permute.xlu0 %v1408_v10 }
  0x47   : > { %323 = vperm.xlu1 %1272, %v265_v3   ;;  %351 = vperm.xlu0 %1276, %v265_v3  }
  0x4b   : > { %1274 = vset.pattern.permute.xlu1 %v1409_v11  ;;  %1277 = vset.pattern.permute.xlu0 %v1402_v4 }
  0x4c   : > { %335 = vperm.xlu1 %1274, %v265_v3  }
  0x50   : > { %1275 = vset.pattern.permute.xlu1 %v1410_v12 }
  0x51   : > { %343 = vperm.xlu1 %1275, %v265_v3  }
  0xae   : > { %v358_v19 = vpop.permute.xlu0 %357  ;;  %v372_v20 = vpop.permute.xlu1 %371 }
  0xaf   : > { %v360_v30 = vmul.f32 %v358_v19, %v275_v22  ;;  %v361_v31 = vmul.f32 %v358_v19, %v279_v23  ;;  %v374_v34 = vmul.f32 %v372_v20, %v311_v26  ;;  %v375_v35 = vmul.f32 %v372_v20, %v315_v27 }
  0xb0   : > { %v1562_v19 = vsub.s32 3, %v1541_v14 }
  0xb3   : > { %v364_v28 = vpop.permute.xlu0 %363  ;;  %v380_v29 = vpop.permute.xlu1 %379 }
  0xb4   : > { %v366_v32 = vmul.f32 %v364_v28, %v292_v24  ;;  %v367_v33 = vmul.f32 %v364_v28, %v296_v25 }
  0xb6   : > { %v368_v36 = vadd.f32 %v366_v32, %v360_v30  ;;  %v369_v37 = vadd.f32 %v367_v33, %v361_v31 }
  0xb8   : > { %v376_v38 = vadd.f32 %v374_v34, %v368_v36  ;;  %v377_v39 = vadd.f32 %v375_v35, %v369_v37  ;;  %v269_v40 = vpop.permute.xlu1 %268  ;;  %v286_v41 = vpop.permute.xlu0 %285 }
  0xb9   : > { %v282_v44 = vmul.f32 %v275_v22, %v269_v40  ;;  %v299_v45 = vmul.f32 %v292_v24, %v286_v41  ;;  %v283_v46 = vmul.f32 %v279_v23, %v269_v40  ;;  %v300_v47 = vmul.f32 %v296_v25, %v286_v41 }
  0xba   : > { %v382_v42 = vadd.f32 %v380_v29, %v376_v38  ;;  %v383_v43 = vadd.f32 %v380_v29, %v377_v39 }
  0xbb   : > { %v301_v49 = vadd.f32 %v299_v45, %v282_v44  ;;  %v302_v51 = vadd.f32 %v300_v47, %v283_v46  ;;  %v1279_v44 = vld [vmem:[%s1522_s4 + $0x8] sm:$0xff]  }
  0xbc   : > { %1282 = vrcp.f32 %v382_v42  ;;  %v1411_v42 = vmov 1.0|1.0  }
  0xbd   : > { %1284 = vrcp.f32 %v383_v43  ;;  %v305_v48 = vpop.permute.xlu1 %304  ;;  %v330_v54 = vpop.permute.xlu0 %329  ;;  %v1278_v43 = vld [vmem:[%s1522_s4] sm:$0xff]  }
  0xbe   : > { %v318_v50 = vmul.f32 %v311_v26, %v305_v48  ;;  %v319_v52 = vmul.f32 %v315_v27, %v305_v48  ;;  %v332_v57 = vmul.f32 %v330_v54, %v275_v22  ;;  %v333_v58 = vmul.f32 %v330_v54, %v279_v23 }
  0xc0   : > { %v320_v55 = vadd.f32 %v318_v50, %v301_v49  ;;  %v321_v56 = vadd.f32 %v319_v52, %v302_v51 }
  0xc2   : > { %v324_v53 = vpop.permute.xlu1 %323  ;;  %v352_v17 = vpop.permute.xlu0 %351 }
  0xc3   : > { %v326_v60 = vadd.f32 %v324_v53, %v320_v55  ;;  %v327_v0 = vadd.f32 %v324_v53, %v321_v56  ;;  %v1281_v53 = vld [vmem:[%s1522_s4 + $0x18] sm:$0xff]  }
  0xc7   : > { %v336_v59 = vpop.permute.xlu1 %335 }
  0xc8   : > { %v338_v61 = vmul.f32 %v336_v59, %v292_v24  ;;  %v339_v62 = vmul.f32 %v336_v59, %v296_v25  ;;  %v1565_v24 = vadd.s32 8, %v1541_v14 }
  0xc9   : > { %v1283_v63 = vpop.eup %1282 }
  0xca   : > { %v1285_v1 = vpop.eup %1284  ;;  %v386_v3 = vmul.f32 %v1283_v63, %v326_v60  ;;  %v340_v4 = vadd.f32 %v338_v61, %v332_v57  ;;  %v341_v5 = vadd.f32 %v339_v62, %v333_v58 }
  0xcb   : > { %v387_v6 = vmul.f32 %v1285_v1, %v327_v0 }
  0xcc   : > { %v1108_v7 = vmax.f32 %v386_v3, 0.0  ;;  %v344_v8 = vpop.permute.xlu1 %343 }
  0xcd   : > { %v1111_v9 = vmax.f32 %v387_v6, 0.0  ;;  %v346_v10 = vmul.f32 %v344_v8, %v311_v26  ;;  %v347_v11 = vmul.f32 %v344_v8, %v315_v27 }
  0xce   : > { %v1109_v12 = vmin.f32 %v1108_v7, 15.0  ;;  %v1412_v7 = vmov 1966171168  }
  0xcf   : > { %v1112_v20 = vmin.f32 %v1111_v9, 15.0  ;;  %v348_v21 = vadd.f32 %v346_v10, %v340_v4  ;;  %v349_v22 = vadd.f32 %v347_v11, %v341_v5  ;;  %v519_v8 = vunpack.c.l.s4 %v1412_v7 }
  0xd0   : > { %v1177_v23 = vcvt.f32.s32 %v1109_v12 }
  0xd1   : > { %v1180_v25 = vcvt.f32.s32 %v1112_v20  ;;  %v354_v28 = vadd.f32 %v352_v17, %v348_v21  ;;  %v355_v29 = vadd.f32 %v352_v17, %v349_v22 }
  0xd2   : > { %v412_v26 = vrot.slane %v1177_v23, %v1547_v15  ;;  %v541_v27 = vrot.slane %v1177_v23, %v1550_v16  ;;  %v667_v30 = vrot.slane %v1177_v23, %v1559_v18  ;;  %v793_v31 = vrot.slane %v1177_v23, %v1562_v19 }
  0xd3   : > { %v388_v32 = vmul.f32 %v1283_v63, %v354_v28  ;;  %v389_v33 = vmul.f32 %v1285_v1, %v355_v29  ;;  %v416_v34 = vrot.slane %v1180_v25, %v1547_v15  ;;  %v545_v35 = vrot.slane %v1180_v25, %v1550_v16 }
  0xd4   : > { %vm417_vm0 = vcmp.eq.s32.totalorder %v1541_v14, %v412_v26  ;;  %vm419_vm1 = vcmp.eq.s32.totalorder %v1565_v24, %v412_v26  ;;  %vm546_vm2 = vcmp.eq.s32.totalorder %v1541_v14, %v541_v27  ;;  %vm548_vm3 = vcmp.eq.s32.totalorder %v1565_v24, %v541_v27 }
  0xd5   : > { %v1114_v36 = vmax.f32 %v388_v32, 0.0  ;;  %v1117_v37 = vmax.f32 %v389_v33, 0.0  ;;  %vm418_vm4 = vcmp.eq.s32.totalorder %v1541_v14, %v416_v34  ;;  %vm420_vm5 = vcmp.eq.s32.totalorder %v1565_v24, %v416_v34  ;;  %vm1127_vm6 = vmpackc.low %vm419_vm1, %vm417_vm0 }
  0xd6   : > { %vm1125_vm7 = vmpackc.low %vm420_vm5, %vm418_vm4  ;;  %vm547_vm8 = vcmp.eq.s32.totalorder %v1541_v14, %v545_v35  ;;  %vm549_vm9 = vcmp.eq.s32.totalorder %v1565_v24, %v545_v35  ;;  %v671_v38 = vrot.slane %v1180_v25, %v1559_v18  ;;  %v797_v39 = vrot.slane %v1180_v25, %v1562_v19 }
  0xd7   : > { %v1115_v40 = vmin.f32 %v1114_v36, 15.0  ;;  %v1118_v41 = vmin.f32 %v1117_v37, 15.0  ;;  %1126 = vmatprep.subr.msk.bf16.mxu0 %vm1125_vm7, %v1411_v42  ;;  %vm1137_vm10 = vmpackc.low %vm549_vm9, %vm547_vm8  ;;  %vm672_vm11 = vcmp.eq.s32.totalorder %v1541_v14, %v667_v30  ;;  %vm674_vm12 = vcmp.eq.s32.totalorder %v1565_v24, %v667_v30 }
  0xd8   : > { %1138 = vmatprep.subr.msk.bf16.mxu1 %vm1137_vm10, %v1411_v42  ;;  %1128 = vmatpush1.bf16.msk.msra.mxu0 %vm1127_vm6, %v1411_v42  ;;  %vm1139_vm13 = vmpackc.low %vm548_vm3, %vm546_vm2  ;;  %vm673_vm14 = vcmp.eq.s32.totalorder %v1541_v14, %v671_v38  ;;  %vm675_vm15 = vcmp.eq.s32.totalorder %v1565_v24, %v671_v38  ;;  %vm799_vm0 = vcmp.eq.s32.totalorder %v1541_v14, %v797_v39  ;;  %vm438_vm1 = vcmask 130048  }
  0xd9   : > { %v1183_v45 = vcvt.f32.s32 %v1115_v40  ;;  %v1186_v46 = vcvt.f32.s32 %v1118_v41  ;;  %1140 = vmatpush1.bf16.msk.msra.mxu1 %vm1139_vm13, %v1411_v42  ;;  %vm1149_vm4 = vmpackc.low %vm675_vm15, %vm673_vm14  ;;  %vm801_vm5 = vcmp.eq.s32.totalorder %v1565_v24, %v797_v39  ;;  %vm798_vm6 = vcmp.eq.s32.totalorder %v1541_v14, %v793_v31 }
  0xda   : > { %1150 = vmatprep.subr.msk.bf16.mxu0 %vm1149_vm4, %v1411_v42  ;;  %vm1161_vm7 = vmpackc.low %vm801_vm5, %vm799_vm0  ;;  %vm800_vm2 = vcmp.eq.s32.totalorder %v1565_v24, %v793_v31  ;;  %v520_v29 = vunpack.c.0.s8 %v519_v8 }
  0xdb   : > { %1162 = vmatprep.subr.msk.bf16.mxu1 %vm1161_vm7, %v1411_v42  ;;  %1129 = vmatmul.mubr.msk.bf16.vlgmr.msra.gmra.mxu0 %vm438_vm1, %v1278_v43  ;;  %vm1151_vm3 = vmpackc.low %vm674_vm12, %vm672_vm11  ;;  %v488_v47 = vrot.slane %v1183_v45, %v1547_v15  ;;  %v617_v48 = vrot.slane %v1183_v45, %v1550_v16  ;;  %v492_v49 = vrot.slane %v1186_v46, %v1547_v15  ;;  %v1280_v15 = vld [vmem:[%s1522_s4 + $0x10] sm:$0xff]   ;;  %s980_s4 = scalar_lea.hbm %s1748_s3, %s1174_s21 }
  0xdc   : > { %1141 = vmatmul.mubr.msk.bf16.vlgmr.msra.gmra.mxu1 %vm438_vm1, %v1279_v44  ;;  %1152 = vmatpush1.bf16.msk.msra.mxu0 %vm1151_vm3, %v1411_v42  ;;  %vm1163_vm8 = vmpackc.low %vm800_vm2, %vm798_vm6  ;;  %v621_v50 = vrot.slane %v1186_v46, %v1550_v16  ;;  %v1608_v51 = vrot.slane %v1183_v45, %v1559_v18  ;;  %v1611_v52 = vrot.slane %v1183_v45, %v1562_v19 }
  0xdd   : > { %1164 = vmatpush1.bf16.msk.msra.mxu1 %vm1163_vm8, %v1411_v42  ;;  %729 = vmatprep.mubr.bf16.mxu0 %v1401_v2  ;;  %vm495_vm9 = vcmp.eq.s32.totalorder %v1565_v24, %v488_v47  ;;  %vm624_vm10 = vcmp.eq.s32.totalorder %v1565_v24, %v617_v48  ;;  %vm496_vm11 = vcmp.eq.s32.totalorder %v1565_v24, %v492_v49 }
  0xde   : > { %855 = vmatprep.mubr.bf16.mxu1 %v1401_v2  ;;  %vm625_vm12 = vcmp.eq.s32.totalorder %v1565_v24, %v621_v50  ;;  %v1621_v16 = vrot.slane %v1186_v46, %v1559_v18  ;;  %v1625_v54 = vrot.slane %v1186_v46, %v1562_v19  ;;  %vm750_vm13 = vcmp.eq.s32.totalorder %v1565_v24, %v1608_v51 }
  0xdf   : > { %vm876_vm14 = vcmp.eq.s32.totalorder %v1565_v24, %v1611_v52  ;;  %vm493_vm4 = vcmp.eq.s32.totalorder %v1541_v14, %v488_v47  ;;  %vm622_vm5 = vcmp.eq.s32.totalorder %v1541_v14, %v617_v48  ;;  %vm494_vm6 = vcmp.eq.s32.totalorder %v1541_v14, %v492_v49 }
  0xe0   : > { %vm751_vm15 = vcmp.eq.s32.totalorder %v1565_v24, %v1621_v16  ;;  %vm877_vm0 = vcmp.eq.s32.totalorder %v1565_v24, %v1625_v54  ;;  %vm623_vm7 = vcmp.eq.s32.totalorder %v1541_v14, %v621_v50  ;;  %vm874_vm2 = vcmp.eq.s32.totalorder %v1541_v14, %v1611_v52 }
  0xe1   : > { %vm749_vm3 = vcmp.eq.s32.totalorder %v1541_v14, %v1621_v16  ;;  %vm875_vm8 = vcmp.eq.s32.totalorder %v1541_v14, %v1625_v54 }
  0xe3   : > { %1153 = vmatmul.mubr.msk.bf16.vlgmr.msra.gmra.mxu0 %vm438_vm1, %v1280_v15 }
  0xe4   : > { %1165 = vmatmul.mubr.msk.bf16.vlgmr.msra.gmra.mxu1 %vm438_vm1, %v1281_v53  ;;  %vm748_vm1 = vcmp.eq.s32.totalorder %v1541_v14, %v1608_v51 }
 0x19b   : > { %v476_v55 = vpop.f32.mrf.mxu0 }
 0x19c   : > { %v605_v56 = vpop.f32.mrf.mxu1  ;;  %v497_v60 = vsel %vm493_vm4, %v476_v55, 0.0 }
 0x19d   : > { %v478_v57 = vpop.f32.mrf.mxu0  ;;  %v626_v63 = vsel %vm622_vm5, %v605_v56, 0.0 }
 0x19e   : > { %v607_v58 = vpop.f32.mrf.mxu1  ;;  %v498_v4 = vsel %vm494_vm6, %v478_v57, 0.0 }
 0x19f   : > { %v480_v59 = vpop.f32.mrf.mxu0  ;;  %v627_v10 = vsel %vm623_vm7, %v607_v58, 0.0 }
 0x1a0   : > { %v499_v61 = vsel %vm495_vm9, %v480_v59, 0.0  ;;  %v609_v62 = vpop.f32.mrf.mxu1  ;;  %vm1677_vm9 = vcmp.lt.s32.totalorder %v272_v13, 256 }
 0x1a1   : > { %v501_v0 = vadd.f32 %v499_v61, %v497_v60  ;;  %v628_v1 = vsel %vm624_vm10, %v609_v62, 0.0  ;;  %v482_v3 = vpop.f32.mrf.mxu0  ;;  %v1673_v61 = vsub.s32 %v520_v29, %v1541_v14 }
 0x1a2   : > { %v630_v5 = vadd.f32 %v628_v1, %v626_v63  ;;  %v500_v6 = vsel %vm496_vm11, %v482_v3, 0.0  ;;  %v611_v9 = vpop.f32.mrf.mxu1 }
 0x1a3   : > { %v502_v11 = vrot.slane %v501_v0, 4  ;;  %v508_v12 = vadd.f32 %v500_v6, %v498_v4  ;;  %v629_v17 = vsel %vm625_vm12, %v611_v9, 0.0  ;;  %v731_v18 = vpop.f32.mrf.mxu0 }
 0x1a4   : > { %v631_v19 = vrot.slane %v630_v5, 4  ;;  %v637_v20 = vadd.f32 %v629_v17, %v627_v10  ;;  %v857_v21 = vpop.f32.mrf.mxu1  ;;  %v752_v32 = vsel %vm748_vm1, %v731_v18, 0.0 }
 0x1a5   : > { %v503_v22 = vadd.f32 %v502_v11, %v501_v0  ;;  %v509_v23 = vrot.slane %v508_v12, 4  ;;  %v733_v25 = vpop.f32.mrf.mxu0  ;;  %v878_v33 = vsel %vm874_vm2, %v857_v21, 0.0 }
 0x1a6   : > { %v632_v28 = vadd.f32 %v631_v19, %v630_v5  ;;  %v638_v26 = vrot.slane %v637_v20, 4  ;;  %v859_v27 = vpop.f32.mrf.mxu1  ;;  %v753_v37 = vsel %vm749_vm3, %v733_v25, 0.0 }
 0x1a7   : > { %v504_v30 = vrot.slane %v503_v22, 2  ;;  %v510_v31 = vadd.f32 %v509_v23, %v508_v12  ;;  %v735_v34 = vpop.f32.mrf.mxu0  ;;  %v879_v59 = vsel %vm875_vm8, %v859_v27, 0.0 }
 0x1a8   : > { %v633_v35 = vrot.slane %v632_v28, 2  ;;  %v639_v36 = vadd.f32 %v638_v26, %v637_v20  ;;  %v754_v38 = vsel %vm750_vm13, %v735_v34, 0.0  ;;  %v861_v39 = vpop.f32.mrf.mxu1 }
 0x1a9   : > { %v505_v40 = vadd.f32 %v504_v30, %v503_v22  ;;  %v511_v41 = vrot.slane %v510_v31, 2  ;;  %v756_v42 = vadd.f32 %v754_v38, %v752_v32  ;;  %v880_v43 = vsel %vm876_vm14, %v861_v39, 0.0  ;;  %v737_v44 = vpop.f32.mrf.mxu0 }
 0x1aa   : > { %v634_v45 = vadd.f32 %v633_v35, %v632_v28  ;;  %v640_v46 = vrot.slane %v639_v36, 2  ;;  %v882_v47 = vadd.f32 %v880_v43, %v878_v33  ;;  %v755_v48 = vsel %vm751_vm15, %v737_v44, 0.0  ;;  %v863_v49 = vpop.f32.mrf.mxu1 }
 0x1ab   : > { %v506_v50 = vrot.slane %v505_v40, 1  ;;  %v512_v51 = vadd.f32 %v511_v41, %v510_v31  ;;  %v757_v15 = vrot.slane %v756_v42, 4  ;;  %v763_v53 = vadd.f32 %v755_v48, %v753_v37 }
 0x1ac   : > { %v635_v55 = vrot.slane %v634_v45, 1  ;;  %v641_v56 = vadd.f32 %v640_v46, %v639_v36  ;;  %v883_v57 = vrot.slane %v882_v47, 4  ;;  %v881_v52 = vsel %vm877_vm0, %v863_v49, 0.0 }
 0x1ad   : > { %v513_v58 = vrot.slane %v512_v51, 1  ;;  %v758_v60 = vadd.f32 %v757_v15, %v756_v42  ;;  %v764_v16 = vrot.slane %v763_v53, 4  ;;  %v889_v0 = vadd.f32 %v881_v52, %v879_v59 }
 0x1ae   : > { %v642_v62 = vrot.slane %v641_v56, 1  ;;  %v884_v63 = vadd.f32 %v883_v57, %v882_v47  ;;  %v507_v1 = vadd.f32 %v506_v50, %v505_v40  ;;  %v636_v6 = vadd.f32 %v635_v55, %v634_v45 }
 0x1af   : > { %v514_v3 = vadd.f32 %v513_v58, %v512_v51  ;;  %v759_v4 = vrot.slane %v758_v60, 2  ;;  %v765_v5 = vadd.f32 %v764_v16, %v763_v53  ;;  %v890_v8 = vrot.slane %v889_v0, 4 }
 0x1b0   : > { %v643_v24 = vadd.f32 %v642_v62, %v641_v56  ;;  %v885_v7 = vrot.slane %v884_v63, 2 }
 0x1b1   : > { %v517_v9 = vcombine.low %v507_v1, %v514_v3  ;;  %v760_v10 = vadd.f32 %v759_v4, %v758_v60  ;;  %v766_v54 = vrot.slane %v765_v5, 2  ;;  %v891_v17 = vadd.f32 %v890_v8, %v889_v0 }
 0x1b2   : > { %v646_v11 = vcombine.low %v636_v6, %v643_v24  ;;  %v886_v12 = vadd.f32 %v885_v7, %v884_v63 }
 0x1b3   : > { %v524_v14 = vrot.slane %v517_v9, %v1673_v61  ;;  %v761_v18 = vrot.slane %v760_v10, 1  ;;  %v767_v19 = vadd.f32 %v766_v54, %v765_v5  ;;  %v892_v22 = vrot.slane %v891_v17, 2 }
 0x1b4   : > { %v653_v21 = vrot.slane %v646_v11, %v1673_v61  ;;  %v887_v29 = vrot.slane %v886_v12, 1 }
 0x1b5   : > { %v531_v23 = vrot.slane %v524_v14, %v1673_v61  ;;  %v768_v25 = vrot.slane %v767_v19, 1  ;;  %v893_v26 = vadd.f32 %v892_v22, %v891_v17  ;;  %v762_v27 = vadd.f32 %v761_v18, %v760_v10 }
 0x1b6   : > { %v660_v28 = vrot.slane %v653_v21, %v1673_v61  ;;  %v888_v32 = vadd.f32 %v887_v29, %v886_v12 }
 0x1b7   : > { %537 = vst.msk [vmem:[#allocation2] ss:$4 sm:$0x3] %vm1677_vm9, %v531_v23  ;;  %v769_v30 = vadd.f32 %v768_v25, %v767_v19  ;;  %v894_v13 = vrot.slane %v893_v26, 1 }
 0x1b8   : > { %663 = vst.msk [vmem:[#allocation2 + $0x1] ss:$4 sm:$0x3] %vm1677_vm9, %v660_v28 }
 0x1b9   : > { %v772_v31 = vcombine.low %v762_v27, %v769_v30  ;;  %v895_v33 = vadd.f32 %v894_v13, %v893_v26 }
 0x1bb   : > { %v779_v34 = vrot.slane %v772_v31, %v1673_v61  ;;  %v898_v35 = vcombine.low %v888_v32, %v895_v33 }
 0x1bd   : > { %v786_v36 = vrot.slane %v779_v34, %v1673_v61  ;;  %v905_v37 = vrot.slane %v898_v35, %v1673_v61 }
 0x1bf   : > { %789 = vst.msk [vmem:[#allocation2 + $0x2] ss:$4 sm:$0x3] %vm1677_vm9, %v786_v36  ;;  %v912_v38 = vrot.slane %v905_v37, %v1673_v61 }
 0x1c1   : > { %915 = vst.msk [vmem:[#allocation2 + $0x3] ss:$4 sm:$0x3] %vm1677_vm9, %v912_v38 }
 0x1c8   : > { %v916_v39 = vld [vmem:[#allocation2] sm:$0xff] }
 0x1c9   : > { %vm917_vm10 = vcmp.ne.f32.partialorder %v916_v39, 0.0 }
 0x1ca   : > { %v918_v40 = vsel %vm917_vm10, 1, %v1401_v2 }
 0x1cb   : > { %v919_v41 = vpack.c.b16 %v918_v40, %v918_v40 }
 0x1cd   : > { %v920_v42 = vpack.c.b8 %v919_v41, %v919_v41 }
 0x1cf   : > { %vm921_vm11 = vnez %v920_v42 }
 0x1d0   : > { %v922_v43 = vsel %vm921_vm11, 16843009, %v1401_v2 }
 0x1d1   : > { %v929_v44 = vrot.slane %v922_v43, %v1673_v61 }
 0x1d3   : > { %v930_v45 = vcombine.high %v929_v44, %v929_v44  ;;  %v937_v46 = vrot.slane %v929_v44, %v1673_v61 }
 0x1d5   : > { %v944_v47 = vrot.slane %v930_v45, %v1673_v61  ;;  %vm945_vm12 = vnez %v937_v46 }
 0x1d6   : > { %v947_v48 = vsel %vm945_vm12, 16843009, %v1401_v2 }
 0x1d7   : > { %vm946_vm13 = vnez %v944_v47 }
 0x1d8   : > { %v948_v49 = vsel %vm946_vm13, 16843009, %v1401_v2 }
 0x1d9   : > { %v949_v50 = vcombine.low %v947_v48, %v948_v49 }
 0x1db   : > { %v956_v51 = vrot.slane %v949_v50, %v1673_v61 }
 0x1dd   : > { %1166 = vst.sshfl [vmem:[%s241_s22] sm:$0x5 pattern:$0x73625140] %v956_v51 }
 0x1de   : > { %1327 = shalt.err (!%p1324_p7)
}
 0x1df   : > { %s1328_s24 = scalar_lea.hbm %s980_s4, 32  ;;  %s1332_s10 = scalar_lea.hbm %s1748_s3, 64 }
 0x1e0   : > { %p1329_p10 = scmp.ne.s32.totalorder %s980_s4, %s1328_s24  ;;  %p1333_p2 = scmp.lt.s32.totalorder %s980_s4, %s1748_s3 }
 0x1e1   : > { %p1334_p12 = scmp.lt.s32.totalorder %s1332_s10, %s1328_s24 }
 0x1e2   : > { %p1330_p4 = pnand %p1329_p10, %p1485_p9 }
 0x1e3   : > { %p1335_p8 = por %p1334_p12, %p1333_p2 }
 0x1e4   : > { %p1331_p13 = pneg %p1330_p4 }
 0x1e6   : > { %p1336_p0 = pnand %p1335_p8, %p1331_p13 }
 0x1e8   : > { %1339 = shalt.err (!%p1336_p0)
}
 0x1e9   : > { %1189 = dma.vmem_to_hbm [thread:$0]  (%p1485_p9), %s983_s23, 32, %s980_s4, %s966_s5  }
 0x1ea PF: > { %s994_s19 = sand.u32 1, %s1374_s12   ;;  %p1756_p1 = scmp.ge.s32.totalorder %s1394_s17, 2 }
 0x1eb   : > { %s995_s21 = scalar_lea.sflag [#allocation5], %s994_s19 }
 0x1ec   : > { %p1196_p3 = pnand %p1756_p1, %p1492_p11 }
 0x1ee   : > { %p1197_p5 = pneg %p1196_p3 }
 0x1f0   : > { %1369 = dma.done.wait (%p1197_p5), %s995_s21, 32  }
 0x1f1   : > { %1371 = vsyncadd (%p1197_p5), %s995_s21, 4294967264  ;;  %s19_s17 = sadd.s32 1, %s1394_s17   ;;  %s1757_s12 = smov %s1378_s13 }
 0x1f2   : > { %p16_p6 = scmp.ge.s32.totalorder %s19_s17, 4   ;;  %s1758_s13 = smov %s1382_s14 }
 0x1f3   : > { %s1759_s14 = smov %s1490_s26  ;;  %s1760_s15 = smov %s1390_s16 }
 0x1f4   : > { %s1761_s16 = smov %s1763_s20  ;;  %18 = sbr.rel (!%p16_p6) target bundleno = 6 (0x6), region = 91 }
 0x1f9   :  { %1000 = vsyncpa [#allocation4], 1 }
 0x1fa   :  { %1002 = vsyncpa [#allocation4 + $0x1], 1 }
 0x1fb   :  { %1003 = vsyncpa [#allocation5], 1 }
 0x1fc   :  { %1005 = vsyncpa [#allocation5 + $0x1], 1 }

</bundles_post_ra>
